<compile_context>
chip_gen: v5e
topology: v5e:2x2
jax: 0.10.0
libtpu: 0.0.40
codegen_flags: <defaults>
</compile_context>

<pallas_src>
import functools

import jax
import jax.numpy as jnp
from jax.experimental import pallas as pl
from jax.experimental.pallas import tpu as pltpu


def _round_up(x, n):
    return ((x + n - 1) // n) * n


def _pick_tile_m(num_rows, num_classes, dtype, vmem_budget_bytes=16 * 1024 * 1024):
    """Pick the largest row tile that keeps VMEM usage under a safe budget.

    Budget accounts for: double-buffered preds tile (lane dim padded to 128),
    ~4 f32 (tile_m, C) temporaries inside the kernel, and two double-buffered
    (tile_m, 1) column inputs (each pads to 128 lanes in VMEM).
    """
    c_pad = _round_up(max(num_classes, 1), 128)
    itemsize = jnp.dtype(dtype).itemsize
    bytes_per_row = 2 * c_pad * itemsize + 4 * c_pad * 4 + 2 * 2 * 128 * 4
    tile = vmem_budget_bytes // bytes_per_row
    tile = max(128, min(2048, (tile // 128) * 128))
    # Don't over-pad tiny inputs.
    tile = min(tile, _round_up(num_rows, 128))
    return int(tile)


def _focal_loss_kernel(preds_ref, labels_ref, alpha_ref, out_ref, *, gamma):
    x = preds_ref[...].astype(jnp.float32)          # (tm, C)
    lab = labels_ref[...]                           # (tm, 1) int32
    alpha_t = alpha_ref[...]                        # (tm, 1) f32, 0 on pad rows

    # log-sum-exp pieces (numerically stable), per row.
    row_max = jnp.max(x, axis=-1, keepdims=True)                      # (tm, 1)
    sum_exp = jnp.sum(jnp.exp(x - row_max), axis=-1, keepdims=True)   # (tm, 1)

    # Gather the raw logit at the label column via a one-hot masked lane reduce.
    col = jax.lax.broadcasted_iota(jnp.int32, x.shape, 1)
    onehot = (col == lab).astype(jnp.float32)                         # (tm, C)
    x_t = jnp.sum(x * onehot, axis=-1, keepdims=True)                 # (tm, 1)

    logp_t = (x_t - row_max) - jnp.log(sum_exp)     # log_softmax at label
    p_t = jnp.exp(logp_t)                           # softmax at label
    q = 1.0 - p_t

    # (1 - p_t) ** gamma
    if float(gamma) == int(gamma) and gamma >= 0:
        # Integer exponent -> plain VPU multiply chain, no exp/log edge cases.
        n = int(gamma)
        pow_q = jnp.ones_like(q)
        base = q
        while n > 0:
            if n & 1:
                pow_q = pow_q * base
            n >>= 1
            if n:
                base = base * base
    else:
        pow_q = jnp.power(q, jnp.float32(gamma))

    # Padded rows have alpha_t == 0 -> contribute exactly 0.
    loss = -alpha_t * pow_q * logp_t                # (tm, 1)

    partial = jnp.sum(loss)
    lane = jax.lax.broadcasted_iota(jnp.int32, out_ref.shape, 1)
    out_ref[...] = jnp.where(lane == 0, partial, jnp.float32(0.0))


def focal_loss_pallas(preds, labels, alpha_vec, *, gamma=2, size_average=True,
                      tile_m=None):
    """preds: [..., C] float (any float dtype), labels: [...] int, alpha_vec: [C]."""
    num_classes = preds.shape[-1]
    preds2d = preds.reshape(-1, num_classes)          # keep native dtype in HBM
    labels1d = labels.reshape(-1).astype(jnp.int32)
    m = preds2d.shape[0]

    if tile_m is None:
        tile_m = _pick_tile_m(m, num_classes, preds2d.dtype)

    m_pad = _round_up(m, tile_m)
    pad = m_pad - m

    # Per-row alpha gathered in the wrapper; zero on padded rows = free masking.
    alpha_rows = alpha_vec.astype(jnp.float32)[labels1d]
    if pad:
        preds2d = jnp.pad(preds2d, ((0, pad), (0, 0)))
        labels1d = jnp.pad(labels1d, (0, pad))
        alpha_rows = jnp.pad(alpha_rows, (0, pad))

    labels_col = labels1d.reshape(m_pad, 1)
    alpha_col = alpha_rows.reshape(m_pad, 1)

    grid_m = m_pad // tile_m
    kernel = functools.partial(_focal_loss_kernel, gamma=gamma)

    partials = pl.pallas_call(
        kernel,
        out_shape=jax.ShapeDtypeStruct((1, grid_m * 128), jnp.float32),
        grid_spec=pltpu.PrefetchScalarGridSpec(
            num_scalar_prefetch=0,
            grid=(grid_m,),
            in_specs=[
                pl.BlockSpec((tile_m, num_classes), lambda i: (i, 0)),
                pl.BlockSpec((tile_m, 1), lambda i: (i, 0)),
                pl.BlockSpec((tile_m, 1), lambda i: (i, 0)),
            ],
            out_specs=pl.BlockSpec((1, 128), lambda i: (0, i)),
        ),
        compiler_params=pltpu.CompilerParams(
            dimension_semantics=("parallel",),
            vmem_limit_bytes=32 * 1024 * 1024),
    )(preds2d, labels_col, alpha_col)

    total = jnp.sum(partials)
    if size_average:
        total = total / jnp.float32(m)
    return total


def focal_loss_reference(preds, labels, alpha_vec, *, gamma=2,
                         size_average=True):
    """Plain-JAX reference mirroring the PyTorch module."""
    c = preds.shape[-1]
    preds2d = preds.reshape(-1, c).astype(jnp.float32)
    lab = labels.reshape(-1).astype(jnp.int32)
    logp = jax.nn.log_softmax(preds2d, axis=1)
    p = jnp.exp(logp)
    p_t = jnp.take_along_axis(p, lab[:, None], axis=1)[:, 0]
    logp_t = jnp.take_along_axis(logp, lab[:, None], axis=1)[:, 0]
    a_t = alpha_vec.astype(jnp.float32)[lab]
    loss = -a_t * jnp.power(1.0 - p_t, gamma) * logp_t
    return jnp.mean(loss) if size_average else jnp.sum(loss)


def make_alpha(alpha=0.25, num_classes=2):
    # matches module __init__: alpha[0]=alpha, alpha[1:]=1-alpha
    a = jnp.zeros((num_classes,), jnp.float32)
    a = a.at[0].set(alpha)
    a = a.at[1:].set(1.0 - alpha)
    return a


if __name__ == "__main__":
    key = jax.random.PRNGKey(0)

    # Case 1: module defaults (num_classes=2), detection-style [B, N, C], f32.
    B, N, C = 2, 8, 2
    kp, kl, key = jax.random.split(key, 3)
    preds = jax.random.normal(kp, (B, N, C), dtype=jnp.float32)
    labels = jax.random.randint(kl, (B, N), 0, C, dtype=jnp.int32)
    alpha_vec = make_alpha(alpha=0.25, num_classes=C)

    loss = focal_loss_pallas(preds, labels, alpha_vec, gamma=2,
                             size_average=True)
    loss = jax.block_until_ready(loss)
    ref = focal_loss_reference(preds, labels, alpha_vec, gamma=2,
                               size_average=True)
    assert jnp.allclose(loss, ref, rtol=1e-5, atol=1e-6), (loss, ref)

    # Case 2: multi-tile grid (forced small tile), C=5, size_average=False.
    B2, N2, C2 = 3, 100, 5
    kp2, kl2, key = jax.random.split(key, 3)
    preds2 = jax.random.normal(kp2, (B2, N2, C2), dtype=jnp.float32)
    labels2 = jax.random.randint(kl2, (B2, N2), 0, C2, dtype=jnp.int32)
    alpha_vec2 = make_alpha(alpha=0.25, num_classes=C2)

    loss2 = focal_loss_pallas(preds2, labels2, alpha_vec2, gamma=2,
                              size_average=False, tile_m=128)
    loss2 = jax.block_until_ready(loss2)
    ref2 = focal_loss_reference(preds2, labels2, alpha_vec2, gamma=2,
                                size_average=False)
    assert jnp.allclose(loss2, ref2, rtol=1e-5, atol=1e-5), (loss2, ref2)

    # Case 3: bf16 logits stay bf16 in HBM (half the bytes moved), f32 compute.
    preds3 = preds.astype(jnp.bfloat16)
    loss3 = focal_loss_pallas(preds3, labels, alpha_vec, gamma=2,
                              size_average=True)
    loss3 = jax.block_until_ready(loss3)
    ref3 = focal_loss_reference(preds3, labels, alpha_vec, gamma=2,
                                size_average=True)
    assert jnp.allclose(loss3, ref3, rtol=1e-4, atol=1e-5), (loss3, ref3)

    print("KERNEL_OK")
</pallas_src>

<mosaic_0001>
module attributes {stable_mosaic.version = 11 : i64} {
  func.func @_focal_loss_kernel(%arg0: i32, %arg1: memref<128x2xf32, #tpu.memory_space<vmem>>, %arg2: memref<128x1xi32, #tpu.memory_space<vmem>>, %arg3: memref<128x1xf32, #tpu.memory_space<vmem>>, %arg4: memref<1x128xf32, #tpu.memory_space<vmem>>) attributes {dimension_semantics = [#tpu.dimension_semantics<parallel>], iteration_bounds = array<i64: 1>, scalar_prefetch = 0 : i64, scratch_operands = 0 : i64, tpu.core_type = #tpu.core_type<tc>, window_params = [{transform_indices = @transform_0, window_bounds = array<i64: 128, 2>}, {transform_indices = @transform_1, window_bounds = array<i64: 128, 1>}, {transform_indices = @transform_2, window_bounds = array<i64: 128, 1>}, {transform_indices = @transform_3, window_bounds = array<i64: 1, 128>}]} {
    %c0 = arith.constant 0 : index
    %c0_0 = arith.constant 0 : index
    %0 = vector.load %arg1[%c0, %c0_0] : memref<128x2xf32, #tpu.memory_space<vmem>>, vector<128x2xf32>
    %c0_1 = arith.constant 0 : index
    %c0_2 = arith.constant 0 : index
    %1 = vector.load %arg2[%c0_1, %c0_2] : memref<128x1xi32, #tpu.memory_space<vmem>>, vector<128x1xi32>
    %c0_3 = arith.constant 0 : index
    %c0_4 = arith.constant 0 : index
    %2 = vector.load %arg3[%c0_3, %c0_4] : memref<128x1xf32, #tpu.memory_space<vmem>>, vector<128x1xf32>
    %cst = arith.constant dense<0xFF800000> : vector<128xf32>
    %3 = vector.multi_reduction <maximumf>, %0, %cst [1] : vector<128x2xf32> to vector<128xf32>
    %4 = vector.shape_cast %3 : vector<128xf32> to vector<128x1xf32>
    %5 = vector.broadcast %4 : vector<128x1xf32> to vector<128x2xf32>
    %6 = arith.subf %0, %5 : vector<128x2xf32>
    %7 = math.exp %6 : vector<128x2xf32>
    %cst_5 = arith.constant dense<0.000000e+00> : vector<128xf32>
    %8 = vector.multi_reduction <add>, %7, %cst_5 [1] : vector<128x2xf32> to vector<128xf32>
    %9 = vector.shape_cast %8 : vector<128xf32> to vector<128x1xf32>
    %10 = tpu.iota {dimensions = array<i32: 1>} : vector<128x2xi32>
    %11 = vector.broadcast %1 : vector<128x1xi32> to vector<128x2xi32>
    %12 = arith.cmpi eq, %10, %11 : vector<128x2xi32>
    %13 = arith.extui %12 : vector<128x2xi1> to vector<128x2xi32>
    %14 = arith.sitofp %13 : vector<128x2xi32> to vector<128x2xf32>
    %15 = arith.mulf %0, %14 : vector<128x2xf32>
    %cst_6 = arith.constant dense<0.000000e+00> : vector<128xf32>
    %16 = vector.multi_reduction <add>, %15, %cst_6 [1] : vector<128x2xf32> to vector<128xf32>
    %17 = vector.shape_cast %16 : vector<128xf32> to vector<128x1xf32>
    %18 = arith.subf %17, %4 : vector<128x1xf32>
    %19 = math.log %9 : vector<128x1xf32>
    %20 = arith.subf %18, %19 : vector<128x1xf32>
    %21 = math.exp %20 : vector<128x1xf32>
    %cst_7 = arith.constant 1.000000e+00 : f32
    %22 = vector.broadcast %cst_7 : f32 to vector<128x1xf32>
    %23 = arith.subf %22, %21 : vector<128x1xf32>
    %cst_8 = arith.constant 1.000000e+00 : f32
    %24 = vector.broadcast %cst_8 : f32 to vector<128x1xf32>
    %25 = arith.mulf %23, %23 : vector<128x1xf32>
    %26 = arith.mulf %24, %25 : vector<128x1xf32>
    %cst_9 = arith.constant 0.000000e+00 : f32
    %27 = vector.broadcast %cst_9 : f32 to vector<128x1xf32>
    %28 = arith.subf %27, %2 : vector<128x1xf32>
    %29 = arith.mulf %28, %26 : vector<128x1xf32>
    %30 = arith.mulf %29, %20 : vector<128x1xf32>
    %31 = vector.shape_cast %30 : vector<128x1xf32> to vector<1x128x1xf32>
    %cst_10 = arith.constant dense<0.000000e+00> : vector<1xf32>
    %32 = vector.multi_reduction <add>, %31, %cst_10 [1, 2] : vector<1x128x1xf32> to vector<1xf32>
    %33 = vector.shape_cast %32 : vector<1xf32> to vector<1x1x1xf32>
    %34 = vector.extract %33[0, 0, 0] : f32 from vector<1x1x1xf32>
    %35 = tpu.iota {dimensions = array<i32: 1>} : vector<1x128xi32>
    %c0_i32 = arith.constant 0 : i32
    %36 = vector.broadcast %c0_i32 : i32 to vector<1x128xi32>
    %37 = arith.cmpi eq, %35, %36 : vector<1x128xi32>
    %cst_11 = arith.constant 0.000000e+00 : f32
    %38 = vector.broadcast %34 : f32 to vector<1x128xf32>
    %39 = vector.broadcast %cst_11 : f32 to vector<1x128xf32>
    %40 = arith.select %37, %38, %39 : vector<1x128xi1>, vector<1x128xf32>
    %c0_12 = arith.constant 0 : index
    %c0_13 = arith.constant 0 : index
    %41 = vector.load %arg4[%c0_12, %c0_13] : memref<1x128xf32, #tpu.memory_space<vmem>>, vector<1x128xf32>
    tpu.vector_store %arg4[%c0_12, %c0_13], %40 {strides = array<i32>} : memref<1x128xf32, #tpu.memory_space<vmem>>, vector<1x128xf32>,
    return
  }
  func.func @transform_0(%arg0: i32) -> (i32, i32) {
    %c0_i32 = arith.constant 0 : i32
    %c0_i32_0 = arith.constant 0 : i32
    return %arg0, %c0_i32 : i32, i32
  }
  func.func @transform_1(%arg0: i32) -> (i32, i32) {
    %c0_i32 = arith.constant 0 : i32
    %c0_i32_0 = arith.constant 0 : i32
    return %arg0, %c0_i32 : i32, i32
  }
  func.func @transform_2(%arg0: i32) -> (i32, i32) {
    %c0_i32 = arith.constant 0 : i32
    %c0_i32_0 = arith.constant 0 : i32
    return %arg0, %c0_i32 : i32, i32
  }
  func.func @transform_3(%arg0: i32) -> (i32, i32) {
    %c0_i32 = arith.constant 0 : i32
    %c0_i32_0 = arith.constant 0 : i32
    return %c0_i32, %arg0 : i32, i32
  }
}

</mosaic_0001>

<bundles_post_ra>
// kernel: tpu_custom_call.1
= control target key start
LH: loop header
LB: loop body
LE: loop exit
PB: predicated region body
PF: predicated region fallthrough
CT: control target
= control target key end

     0   :  { %vm63_vm0 = vcmask 15360   ;;  %s1243_s0 = inlined_call_operand.vmem [shape: f32[128,2], index: 0, kind: input, shape index: {}]   ;;  %s1244_s1 = inlined_call_operand.vmem [shape: s32[128,1], index: 1, kind: input, shape index: {}]   ;;  %s1245_s2 = inlined_call_operand.vmem [shape: f32[128,1], index: 2, kind: input, shape index: {}]   ;;  %s1246_s3 = inlined_call_operand.hbm [shape: f32[1,128], index: 3, kind: output, shape index: {}]  }
   0x1   :  { %v779_v0 = vld [vmem:[%s1243_s0 + $0x20] sm:$0xff]  ;;  %v784_v1 = vld [vmem:[%s1243_s0 + $0x10] sm:$0xff]  ;;  %v800_v6 = vld [vmem:[%s1243_s0 + $0x28] sm:$0xff] }
   0x2   :  { %v789_v2 = vld [vmem:[%s1243_s0] sm:$0xff]  ;;  %v76_v3 = vsel %vm63_vm0, %v779_v0, -inf  ;;  %v70_v4 = vsel %vm63_vm0, %v784_v1, -inf  ;;  %v805_v7 = vld [vmem:[%s1243_s0 + $0x18] sm:$0xff]  ;;  %v810_v8 = vld [vmem:[%s1243_s0 + $0x8] sm:$0xff] }
   0x3   :  { %v64_v5 = vsel %vm63_vm0, %v789_v2, -inf  ;;  %77 = vmax.xlane.f32.xlu2 %v76_v3  ;;  %71 = vmax.xlane.f32.xlu1 %v70_v4 }
   0x4   :  { %65 = vmax.xlane.f32.xlu0 %v64_v5 }
   0x5   :  { %8 = vsyncpa [#allocation3], 0  ;;  %v79_v9 = vsel %vm63_vm0, %v800_v6, -inf  ;;  %v73_v10 = vsel %vm63_vm0, %v805_v7, -inf  ;;  %v67_v11 = vsel %vm63_vm0, %v810_v8, -inf  ;;  %v821_v12 = vld [vmem:[%s1243_s0 + $0x40] sm:$0xff] }
   0x6   :  { %v826_v13 = vld [vmem:[%s1243_s0 + $0x38] sm:$0xff]  ;;  %v753_v14 = vmov 0   ;;  %v831_v15 = vld [vmem:[%s1243_s0 + $0x30] sm:$0xff]  ;;  %v88_v16 = vsel %vm63_vm0, %v821_v12, -inf  ;;  %v842_v19 = vld [vmem:[%s1243_s0 + $0x48] sm:$0xff]  ;;  %s598_s25 = sshll.u32 %s1246_s3, 4  ;;  %s599_s25 = int_to_ptr.hbm [resolvable:$true] %s598_s25 }
   0x7   :  { %628 = vset.pattern.permute.xlu1 %v753_v14  ;;  %629 = vset.pattern.permute.xlu2 %v753_v14  ;;  %v85_v17 = vsel %vm63_vm0, %v826_v13, -inf  ;;  %v82_v18 = vsel %vm63_vm0, %v831_v15, -inf  ;;  %v847_v20 = vld [vmem:[%s1243_s0 + $0x50] sm:$0xff]  ;;  %v852_v21 = vld [vmem:[%s1243_s0 + $0x58] sm:$0xff]  ;;  %v91_v22 = vsel %vm63_vm0, %v842_v19, -inf  ;;  %v863_v25 = vld [vmem:[%s1243_s0 + $0x60] sm:$0xff] }
   0x8   :  { %630 = vset.pattern.permute.xlu0 %v753_v14  ;;  %v94_v23 = vsel %vm63_vm0, %v847_v20, -inf  ;;  %v97_v24 = vsel %vm63_vm0, %v852_v21, -inf  ;;  %v868_v26 = vld [vmem:[%s1243_s0 + $0x68] sm:$0xff]  ;;  %v100_v27 = vsel %vm63_vm0, %v863_v25, -inf  ;;  %v877_v29 = vld [vmem:[%s1243_s0 + $0x70] sm:$0xff]  ;;  %v884_v31 = vld [vmem:[%s1243_s0 + $0x78] sm:$0xff] }
   0x9   :  { %v103_v28 = vsel %vm63_vm0, %v868_v26, -inf  ;;  %v106_v30 = vsel %vm63_vm0, %v877_v29, -inf  ;;  %v109_v32 = vsel %vm63_vm0, %v884_v31, -inf  ;;  %v32_v33 = vld [vmem:[%s1244_s1 + $0x8] sm:$0xff]  ;;  %v33_v34 = vld [vmem:[%s1244_s1 + $0x10] sm:$0xff]  ;;  %v34_v36 = vld [vmem:[%s1244_s1 + $0x18] sm:$0xff] }
   0xa   :  { %v36_v35 = vld [vmem:[%s1244_s1 + $0x28] sm:$0xff]  ;;  %v38_v37 = vld [vmem:[%s1244_s1 + $0x38] sm:$0xff]  ;;  %v31_v38 = vld [vmem:[%s1244_s1] sm:$0xff] }
   0xb   :  { %80 = vmax.xlane.f32.xlu2 %v79_v9  ;;  %74 = vmax.xlane.f32.xlu1 %v73_v10  ;;  %v35_v39 = vld [vmem:[%s1244_s1 + $0x20] sm:$0xff]  ;;  %v40_v41 = vld [vmem:[%s1244_s1 + $0x48] sm:$0xff]  ;;  %v37_v42 = vld [vmem:[%s1244_s1 + $0x30] sm:$0xff] }
   0xc   :  { %68 = vmax.xlane.f32.xlu0 %v67_v11  ;;  %v39_v40 = vld [vmem:[%s1244_s1 + $0x40] sm:$0xff]  ;;  %v41_v43 = vld [vmem:[%s1244_s1 + $0x50] sm:$0xff]  ;;  %v46_v44 = vld [vmem:[%s1244_s1 + $0x78] sm:$0xff] }
   0xd   :  { %v42_v45 = vld [vmem:[%s1244_s1 + $0x58] sm:$0xff]  ;;  %v43_v46 = vld [vmem:[%s1244_s1 + $0x60] sm:$0xff]  ;;  %v44_v47 = vld [vmem:[%s1244_s1 + $0x68] sm:$0xff] }
   0xe   :  { %v45_v48 = vld [vmem:[%s1244_s1 + $0x70] sm:$0xff] }
  0x13   :  { %89 = vmax.xlane.f32.xlu2 %v88_v16  ;;  %86 = vmax.xlane.f32.xlu1 %v85_v17 }
  0x14   :  { %83 = vmax.xlane.f32.xlu0 %v82_v18 }
  0x1b   :  { %92 = vmax.xlane.f32.xlu2 %v91_v22  ;;  %95 = vmax.xlane.f32.xlu1 %v94_v23 }
  0x1c   :  { %98 = vmax.xlane.f32.xlu0 %v97_v24 }
  0x23   :  { %101 = vmax.xlane.f32.xlu2 %v100_v27 }
  0x24   :  { %104 = vmax.xlane.f32.xlu0 %v103_v28 }
  0x2c   :  { %107 = vmax.xlane.f32.xlu0 %v106_v30 }
  0x34   :  { %110 = vmax.xlane.f32.xlu0 %v109_v32  ;;  %214 = vperm.xlu1 %628, %v32_v33  }
  0x3b   :  { %217 = vperm.xlu2 %629, %v33_v34  }
  0x3c   :  { %226 = vperm.xlu1 %628, %v36_v35  }
  0x43   :  { %220 = vperm.xlu2 %629, %v34_v36  }
  0x44   :  { %232 = vperm.xlu1 %628, %v38_v37  }
  0x48   :  { %211 = vperm.xlu0 %630, %v31_v38  }
  0x4b   :  { %223 = vperm.xlu2 %629, %v35_v39  }
  0x4c   :  { %235 = vperm.xlu1 %628, %v39_v40   ;;  %v208_v40 = vlaneseq }
  0x50   :  { %238 = vperm.xlu0 %630, %v40_v41  }
  0x53   :  { %229 = vperm.xlu2 %629, %v37_v42  }
  0x54   :  { %241 = vperm.xlu1 %628, %v41_v43   ;;  %v986_v43 = vand.u32 127, %v208_v40 }
  0x58   :  { %256 = vperm.xlu0 %630, %v46_v44  }
  0x5b   :  { %244 = vperm.xlu2 %629, %v42_v45  }
  0x5c   :  { %247 = vperm.xlu1 %628, %v43_v46  }
  0x63   :  { %250 = vperm.xlu2 %629, %v44_v47  }
  0x64   :  { %253 = vperm.xlu1 %628, %v45_v48  }
  0x76   :  { %v936_v49 = vpop.xlane.xlu2 %77  ;;  %v938_v50 = vpop.xlane.xlu1 %71 }
  0x77   :  { %v940_v51 = vpop.xlane.xlu0 %65  ;;  %v114_v52 = vsub.f32 %v784_v1, %v938_v50  ;;  %v116_v61 = vsub.f32 %v779_v0, %v936_v49 }
  0x78   :  { %v112_v54 = vsub.f32 %v789_v2, %v940_v51 }
  0x79   :  { %v132_v53 = vmul.f32 1.442695, %v114_v52  ;;  %v136_v5 = vmul.f32 1.442695, %v116_v61  ;;  %v754_v52 = vmov 0.0  }
  0x7a   :  { %v128_v55 = vmul.f32 1.442695, %v112_v54 }
  0x7b   :  { %631 = vpow2.f32 %v132_v53 }
  0x7c   :  { %633 = vpow2.f32 %v128_v55 }
  0x7e   :  { %v946_v56 = vpop.xlane.xlu2 %80  ;;  %v950_v58 = vpop.xlane.xlu1 %74 }
  0x7f   :  { %v948_v57 = vpop.xlane.xlu0 %68  ;;  %v115_v60 = vsub.f32 %v805_v7, %v950_v58  ;;  %v117_v14 = vsub.f32 %v800_v6, %v946_v56 }
  0x80   :  { %v113_v59 = vsub.f32 %v810_v8, %v948_v57 }
  0x81   :  { %v632_v63 = vpop.eup %631  ;;  %v134_v3 = vmul.f32 1.442695, %v115_v60  ;;  %v138_v23 = vmul.f32 1.442695, %v117_v14 }
  0x82   :  { %v130_v62 = vmul.f32 1.442695, %v113_v59  ;;  %v166_v4 = vsel %vm63_vm0, %v632_v63, 0.0  ;;  %v634_v10 = vpop.eup %633 }
  0x83   :  { %167 = vadd.xlane.f32.xlu0 %v166_v4  ;;  %v160_v17 = vsel %vm63_vm0, %v634_v10, 0.0 }
  0x84   :  { %635 = vpow2.f32 %v130_v62 }
  0x85   :  { %637 = vpow2.f32 %v134_v3 }
  0x86   :  { %v959_v9 = vpop.xlane.xlu2 %89  ;;  %639 = vpow2.f32 %v136_v5  ;;  %v970_v30 = vpop.xlane.xlu1 %86 }
  0x87   :  { %v963_v16 = vpop.xlane.xlu0 %83  ;;  %641 = vpow2.f32 %v138_v23  ;;  %v120_v41 = vsub.f32 %v821_v12, %v959_v9 }
  0x88   :  { %v118_v42 = vsub.f32 %v831_v15, %v963_v16 }
  0x89   :  { %v144_v44 = vmul.f32 1.442695, %v120_v41 }
  0x8a   :  { %v636_v11 = vpop.eup %635  ;;  %v140_v45 = vmul.f32 1.442695, %v118_v42  ;;  %v119_v42 = vsub.f32 %v826_v13, %v970_v30 }
  0x8b   :  { %v163_v18 = vsel %vm63_vm0, %v636_v11, 0.0  ;;  %v638_v22 = vpop.eup %637  ;;  %643 = vpow2.f32 %v144_v44 }
  0x8c   :  { %161 = vadd.xlane.f32.xlu2 %v160_v17  ;;  %v640_v27 = vpop.eup %639  ;;  %v169_v28 = vsel %vm63_vm0, %v638_v22, 0.0  ;;  %645 = vpow2.f32 %v140_v45 }
  0x8d   :  { %v172_v32 = vsel %vm63_vm0, %v640_v27, 0.0  ;;  %v642_v35 = vpop.eup %641 }
  0x8e   :  { %v967_v24 = vpop.xlane.xlu2 %92  ;;  %164 = vadd.xlane.f32.xlu1 %v163_v18  ;;  %v175_v36 = vsel %vm63_vm0, %v642_v35, 0.0  ;;  %v978_v37 = vpop.xlane.xlu1 %95 }
  0x8f   :  { %v973_v33 = vpop.xlane.xlu0 %98  ;;  %v121_v5 = vsub.f32 %v842_v19, %v967_v24 }
  0x91   :  { %v644_v3 = vpop.eup %643  ;;  %v146_v17 = vmul.f32 1.442695, %v121_v5 }
  0x92   :  { %v646_v4 = vpop.eup %645  ;;  %v184_v11 = vsel %vm63_vm0, %v644_v3, 0.0 }
  0x93   :  { %v178_v14 = vsel %vm63_vm0, %v646_v4, 0.0  ;;  %647 = vpow2.f32 %v146_v17 }
  0x94   :  { %170 = vadd.xlane.f32.xlu2 %v169_v28 }
  0x96   :  { %v975_v34 = vpop.xlane.xlu2 %101  ;;  %173 = vadd.xlane.f32.xlu1 %v172_v32 }
  0x97   :  { %v980_v38 = vpop.xlane.xlu0 %104 }
  0x99   :  { %v648_v44 = vpop.eup %647 }
  0x9e   :  { %v218_v39 = vpop.permute.xlu2 %217  ;;  %176 = vadd.xlane.f32.xlu1 %v175_v36 }
  0x9f   :  { %v990_v48 = vpop.xlane.xlu0 %107  ;;  %vm260_vm6 = vcmp.eq.s32.totalorder %v986_v43, %v218_v39  ;;  %v142_v39 = vmul.f32 1.442695, %v119_v42 }
  0xa6   :  { %v221_v46 = vpop.permute.xlu2 %220  ;;  %v215_v47 = vpop.permute.xlu1 %214 }
  0xa7   :  { %vm261_vm1 = vcmp.eq.s32.totalorder %v986_v43, %v221_v46  ;;  %vm259_vm2 = vcmp.eq.s32.totalorder %v986_v43, %v215_v47  ;;  %v609_v47 = vsel %vm260_vm6, 1.0, %v754_v52 }
  0xa8   :  { %v610_v53 = vsel %vm261_vm1, 1.0, %v754_v52  ;;  %v608_v54 = vsel %vm259_vm2, 1.0, %v754_v52  ;;  %vm587_vm2 = vcmp.eq.s32.totalorder %v986_v43, 0 }
  0xa9   :  { %v307_v55 = vmul.f32 %v608_v54, %v810_v8  ;;  %v309_v59 = vmul.f32 %v610_v53, %v805_v7  ;;  %v123_v7 = vsub.f32 %v852_v21, %v973_v33  ;;  %v1005_v8 = vpop.xlane.xlu0 %110  ;;  %v124_v53 = vsub.f32 %v863_v25, %v975_v34 }
  0xab   :  { %v325_v60 = vsel %vm63_vm0, %v307_v55, 0.0  ;;  %v331_v61 = vsel %vm63_vm0, %v309_v59, 0.0  ;;  %v150_v22 = vmul.f32 1.442695, %v123_v7  ;;  %v187_v55 = vsel %vm63_vm0, %v648_v44, 0.0 }
  0xac   :  { %326 = vadd.xlane.f32.xlu2 %v325_v60  ;;  %332 = vadd.xlane.f32.xlu1 %v331_v61  ;;  %v308_v60 = vmul.f32 %v609_v47, %v784_v1  ;;  %v152_v3 = vmul.f32 1.442695, %v124_v53 }
  0xad   :  { %649 = vpow2.f32 %v150_v22 }
  0xae   :  { %v224_v62 = vpop.permute.xlu2 %223  ;;  %v998_v63 = vpop.permute.xlu1 %226  ;;  %651 = vpow2.f32 %v142_v39  ;;  %v328_v7 = vsel %vm63_vm0, %v308_v60, 0.0 }
  0xaf   :  { %vm262_vm3 = vcmp.eq.s32.totalorder %v986_v43, %v224_v62  ;;  %653 = vpow2.f32 %v152_v3  ;;  %vm263_vm9 = vcmp.eq.s32.totalorder %v986_v43, %v998_v63 }
  0xb0   :  { %v611_v10 = vsel %vm262_vm3, 1.0, %v754_v52 }
  0xb1   :  { %v310_v18 = vmul.f32 %v611_v10, %v779_v0 }
  0xb3   :  { %v334_v35 = vsel %vm63_vm0, %v310_v18, 0.0  ;;  %v650_v46 = vpop.eup %649  ;;  %v122_v18 = vsub.f32 %v847_v20, %v978_v37 }
  0xb4   :  { %185 = vadd.xlane.f32.xlu1 %v184_v11  ;;  %179 = vadd.xlane.f32.xlu2 %v178_v14  ;;  %v193_v59 = vsel %vm63_vm0, %v650_v46, 0.0  ;;  %v652_v17 = vpop.eup %651 }
  0xb6   :  { %v230_v23 = vpop.permute.xlu2 %229  ;;  %v233_v27 = vpop.permute.xlu1 %232 }
  0xb7   :  { %vm264_vm4 = vcmp.eq.s32.totalorder %v986_v43, %v230_v23  ;;  %vm265_vm7 = vcmp.eq.s32.totalorder %v986_v43, %v233_v27  ;;  %v612_v27 = vsel %vm263_vm9, 1.0, %v754_v52 }
  0xb8   :  { %v613_v28 = vsel %vm264_vm4, 1.0, %v754_v52  ;;  %v614_v61 = vsel %vm265_vm7, 1.0, %v754_v52 }
  0xb9   :  { %v312_v32 = vmul.f32 %v613_v28, %v831_v15  ;;  %v313_v10 = vmul.f32 %v614_v61, %v826_v13  ;;  %v654_v13 = vpop.eup %653  ;;  %v148_v28 = vmul.f32 1.442695, %v122_v18 }
  0xba   :  { %v212_v36 = vpop.permute.xlu0 %211  ;;  %v196_v63 = vsel %vm63_vm0, %v654_v13, 0.0 }
  0xbb   :  { %vm258_vm5 = vcmp.eq.s32.totalorder %v986_v43, %v212_v36  ;;  %v340_v40 = vsel %vm63_vm0, %v312_v32, 0.0  ;;  %v343_v1 = vsel %vm63_vm0, %v313_v10, 0.0  ;;  %v127_v32 = vsub.f32 %v884_v31, %v1005_v8 }
  0xbc   :  { %v607_v0 = vsel %vm258_vm5, 1.0, %v754_v52  ;;  %341 = vadd.xlane.f32.xlu1 %v340_v40  ;;  %335 = vadd.xlane.f32.xlu2 %v334_v35  ;;  %v311_v36 = vmul.f32 %v612_v27, %v800_v6 }
  0xbd   :  { %v306_v41 = vmul.f32 %v607_v0, %v789_v2  ;;  %v126_v2 = vsub.f32 %v877_v29, %v990_v48 }
  0xbe   :  { %v1022_v15 = vpop.permute.xlu1 %235  ;;  %v337_v44 = vsel %vm63_vm0, %v311_v36, 0.0 }
  0xbf   :  { %v322_v45 = vsel %vm63_vm0, %v306_v41, 0.0  ;;  %v156_v4 = vmul.f32 1.442695, %v126_v2  ;;  %v158_v41 = vmul.f32 1.442695, %v127_v32  ;;  %vm266_vm13 = vcmp.eq.s32.totalorder %v986_v43, %v1022_v15 }
  0xc0   :  { %323 = vadd.xlane.f32.xlu0 %v322_v45 }
  0xc1   :  { %655 = vpow2.f32 %v156_v4 }
  0xc2   :  { %v239_v54 = vpop.permute.xlu0 %238  ;;  %657 = vpow2.f32 %v148_v28 }
  0xc3   :  { %vm267_vm8 = vcmp.eq.s32.totalorder %v986_v43, %v239_v54  ;;  %659 = vpow2.f32 %v158_v41 }
  0xc4   :  { %v616_v62 = vsel %vm267_vm8, 1.0, %v754_v52  ;;  %188 = vadd.xlane.f32.xlu2 %v187_v55  ;;  %194 = vadd.xlane.f32.xlu1 %v193_v59  ;;  %v615_v59 = vsel %vm266_vm13, 1.0, %v754_v52 }
  0xc5   :  { %v315_v11 = vmul.f32 %v616_v62, %v842_v19  ;;  %v181_v19 = vsel %vm63_vm0, %v652_v17, 0.0  ;;  %v314_v15 = vmul.f32 %v615_v59, %v821_v12 }
  0xc6   :  { %v242_v5 = vpop.permute.xlu1 %241 }
  0xc7   :  { %v349_v14 = vsel %vm63_vm0, %v315_v11, 0.0  ;;  %v656_v23 = vpop.eup %655  ;;  %vm268_vm10 = vcmp.eq.s32.totalorder %v986_v43, %v242_v5  ;;  %v245_v5 = vpop.permute.xlu2 %244 }
  0xc8   :  { %329 = vadd.xlane.f32.xlu0 %v328_v7  ;;  %v202_v35 = vsel %vm63_vm0, %v656_v23, 0.0  ;;  %v617_v40 = vsel %vm268_vm10, 1.0, %v754_v52  ;;  %v658_v53 = vpop.eup %657  ;;  %vm269_vm15 = vcmp.eq.s32.totalorder %v986_v43, %v245_v5 }
  0xc9   :  { %v316_v45 = vmul.f32 %v617_v40, %v847_v20  ;;  %v125_v20 = vsub.f32 %v868_v26, %v980_v38  ;;  %v190_v2 = vsel %vm63_vm0, %v658_v53, 0.0  ;;  %v660_v55 = vpop.eup %659  ;;  %v618_v12 = vsel %vm269_vm15, 1.0, %v754_v52 }
  0xca   :  { %v257_v42 = vpop.permute.xlu0 %256  ;;  %v205_v61 = vsel %vm63_vm0, %v660_v55, 0.0 }
  0xcb   :  { %vm273_vm12 = vcmp.eq.s32.totalorder %v986_v43, %v257_v42  ;;  %v352_v6 = vsel %vm63_vm0, %v316_v45, 0.0  ;;  %v154_v60 = vmul.f32 1.442695, %v125_v20 }
  0xcc   :  { %344 = vadd.xlane.f32.xlu2 %v343_v1  ;;  %350 = vadd.xlane.f32.xlu1 %v349_v14  ;;  %v622_v39 = vsel %vm273_vm12, 1.0, %v754_v52  ;;  %v317_v14 = vmul.f32 %v618_v12, %v852_v21 }
  0xcd   :  { %v321_v54 = vmul.f32 %v622_v39, %v884_v31  ;;  %661 = vpow2.f32 %v154_v60  ;;  %v346_v31 = vsel %vm63_vm0, %v314_v15, 0.0 }
  0xce   :  { %v248_v22 = vpop.permute.xlu1 %247 }
  0xcf   :  { %vm270_vm11 = vcmp.eq.s32.totalorder %v986_v43, %v248_v22  ;;  %v367_v62 = vsel %vm63_vm0, %v321_v54, 0.0  ;;  %v251_v1 = vpop.permute.xlu2 %250 }
  0xd0   :  { %182 = vadd.xlane.f32.xlu0 %v181_v19  ;;  %v619_v0 = vsel %vm270_vm11, 1.0, %v754_v52  ;;  %vm271_vm1 = vcmp.eq.s32.totalorder %v986_v43, %v251_v1 }
  0xd1   :  { %v318_v46 = vmul.f32 %v619_v0, %v863_v25  ;;  %v620_v17 = vsel %vm271_vm1, 1.0, %v754_v52 }
  0xd2   :  { %v319_v18 = vmul.f32 %v620_v17, %v868_v26 }
  0xd3   :  { %v358_v47 = vsel %vm63_vm0, %v318_v46, 0.0  ;;  %v662_v10 = vpop.eup %661 }
  0xd4   :  { %197 = vadd.xlane.f32.xlu2 %v196_v63  ;;  %203 = vadd.xlane.f32.xlu1 %v202_v35  ;;  %v199_v11 = vsel %vm63_vm0, %v662_v10, 0.0  ;;  %v361_v22 = vsel %vm63_vm0, %v319_v18, 0.0 }
  0xd6   :  { %v254_v25 = vpop.permute.xlu1 %253 }
  0xd7   :  { %vm272_vm14 = vcmp.eq.s32.totalorder %v986_v43, %v254_v25 }
  0xd8   :  { %338 = vadd.xlane.f32.xlu0 %v337_v44  ;;  %v621_v3 = vsel %vm272_vm14, 1.0, %v754_v52 }
  0xd9   :  { %v320_v4 = vmul.f32 %v621_v3, %v877_v29  ;;  %v355_v29 = vsel %vm63_vm0, %v317_v14, 0.0 }
  0xdb   :  { %v364_v7 = vsel %vm63_vm0, %v320_v4, 0.0  ;;  %vm546_vm0 = vcmask 7168  }
  0xdc   :  { %353 = vadd.xlane.f32.xlu2 %v352_v6  ;;  %359 = vadd.xlane.f32.xlu1 %v358_v47 }
  0xe0   :  { %191 = vadd.xlane.f32.xlu0 %v190_v2 }
  0xe4   :  { %206 = vadd.xlane.f32.xlu2 %v205_v61  ;;  %368 = vadd.xlane.f32.xlu1 %v367_v62 }
  0xe8   :  { %347 = vadd.xlane.f32.xlu0 %v346_v31 }
  0xec   :  { %365 = vadd.xlane.f32.xlu2 %v364_v7 }
  0xf0   :  { %200 = vadd.xlane.f32.xlu0 %v199_v11 }
  0xf6   :  { %v168_v35 = vpop.xlane.xlu0 %167 }
  0xf8   :  { %356 = vadd.xlane.f32.xlu0 %v355_v29 }
  0xff   :  { %v162_v23 = vpop.xlane.xlu2 %161 }
 0x100   :  { %362 = vadd.xlane.f32.xlu0 %v361_v22 }
 0x101   :  { %v165_v13 = vpop.xlane.xlu1 %164 }
 0x102   :  { %663 = vlog2.f32 %v165_v13 }
 0x103   :  { %665 = vlog2.f32 %v162_v23 }
 0x104   :  { %667 = vlog2.f32 %v168_v35 }
 0x107   :  { %v171_v27 = vpop.xlane.xlu2 %170 }
 0x108   :  { %v664_v41 = vpop.eup %663  ;;  %669 = vlog2.f32 %v171_v27 }
 0x109   :  { %v174_v19 = vpop.xlane.xlu1 %173  ;;  %v666_v42 = vpop.eup %665  ;;  %v389_v47 = vmul.f32 0.6931472, %v664_v41 }
 0x10a   :  { %v668_v6 = vpop.eup %667  ;;  %v387_v53 = vmul.f32 0.6931472, %v666_v42  ;;  %671 = vlog2.f32 %v174_v19  ;;  %v48_v42 = vld [vmem:[%s1245_s2 + $0x8] sm:$0xff] }
 0x10b   :  { %v391_v54 = vmul.f32 0.6931472, %v668_v6 }
 0x10e   :  { %v670_v59 = vpop.eup %669 }
 0x10f   :  { %v393_v61 = vmul.f32 0.6931472, %v670_v59 }
 0x110   :  { %v672_v15 = vpop.eup %671 }
 0x111   :  { %v177_v28 = vpop.xlane.xlu1 %176 }
 0x112   :  { %673 = vlog2.f32 %v177_v28 }
 0x118   :  { %v674_v7 = vpop.eup %673 }
 0x119   :  { %v397_v29 = vmul.f32 0.6931472, %v674_v7 }
 0x11f   :  { %v327_v32 = vpop.xlane.xlu2 %326  ;;  %v333_v63 = vpop.xlane.xlu1 %332 }
 0x120   :  { %v371_v44 = vsub.f32 %v327_v32, %v948_v57  ;;  %v373_v57 = vsub.f32 %v333_v63, %v950_v58  ;;  %v395_v58 = vmul.f32 0.6931472, %v672_v15 }
 0x122   :  { %v1093_v20 = vsub.f32 %v371_v44, %v389_v47  ;;  %v1106_v3 = vsub.f32 %v373_v57, %v393_v61  ;;  %v50_v61 = vld [vmem:[%s1245_s2 + $0x18] sm:$0xff] }
 0x124   :  { %v436_v60 = vmul.f32 1.442695, %v1093_v20  ;;  %v440_v12 = vmul.f32 1.442695, %v1106_v3 }
 0x127   :  { %v180_v21 = vpop.xlane.xlu2 %179  ;;  %v1088_v36 = vpop.xlane.xlu1 %185 }
 0x128   :  { %675 = vlog2.f32 %v180_v21 }
 0x129   :  { %677 = vpow2.f32 %v436_v60 }
 0x12e   :  { %v676_v10 = vpop.eup %675 }
 0x12f   :  { %v336_v40 = vpop.xlane.xlu2 %335  ;;  %v342_v52 = vpop.xlane.xlu1 %341  ;;  %v399_v17 = vmul.f32 0.6931472, %v676_v10 }
 0x130   :  { %v374_v31 = vsub.f32 %v336_v40, %v936_v49  ;;  %v376_v49 = vsub.f32 %v342_v52, %v963_v16  ;;  %v678_v22 = vpop.eup %677 }
 0x131   :  { %v467_v40 = vsub.f32 1.0, %v678_v22 }
 0x132   :  { %v1113_v1 = vsub.f32 %v374_v31, %v395_v58  ;;  %v1122_v63 = vsub.f32 %v376_v49, %v399_v17 }
 0x133   :  { %v324_v0 = vpop.xlane.xlu0 %323  ;;  %v483_v59 = vmul.f32 %v467_v40, %v467_v40 }
 0x134   :  { %v370_v46 = vsub.f32 %v324_v0, %v940_v51  ;;  %v442_v19 = vmul.f32 1.442695, %v1113_v1  ;;  %v446_v44 = vmul.f32 1.442695, %v1122_v63 }
 0x136   :  { %v1099_v55 = vsub.f32 %v370_v46, %v387_v53 }
 0x137   :  { %v189_v26 = vpop.xlane.xlu2 %188  ;;  %v1095_v25 = vpop.xlane.xlu1 %194 }
 0x138   :  { %v434_v62 = vmul.f32 1.442695, %v1099_v55 }
 0x13a   :  { %679 = vpow2.f32 %v434_v62 }
 0x13b   :  { %v330_v45 = vpop.xlane.xlu0 %329 }
 0x13c   :  { %v372_v39 = vsub.f32 %v330_v45, %v938_v50 }
 0x13e   :  { %v1102_v51 = vsub.f32 %v372_v39, %v391_v54  ;;  %v499_v54 = vsub.f32 0.0, %v48_v42 }
 0x13f   :  { %v1097_v2 = vpop.xlane.xlu2 %344  ;;  %v1110_v11 = vpop.xlane.xlu1 %350 }
 0x140   :  { %v438_v4 = vmul.f32 1.442695, %v1102_v51  ;;  %v680_v13 = vpop.eup %679  ;;  %v377_v45 = vsub.f32 %v1097_v2, %v970_v30  ;;  %v379_v30 = vsub.f32 %v1110_v11, %v967_v24  ;;  %v515_v10 = vmul.f32 %v499_v54, %v483_v59 }
 0x141   :  { %v466_v16 = vsub.f32 1.0, %v680_v13 }
 0x143   :  { %v183_v50 = vpop.xlane.xlu0 %182  ;;  %v482_v47 = vmul.f32 %v466_v16, %v466_v16 }
 0x144   :  { %681 = vlog2.f32 %v183_v50 }
 0x145   :  { %683 = vpow2.f32 %v438_v4 }
 0x146   :  { %685 = vpow2.f32 %v440_v12  ;;  %v501_v12 = vsub.f32 0.0, %v50_v61 }
 0x147   :  { %v198_v5 = vpop.xlane.xlu2 %197  ;;  %687 = vlog2.f32 %v189_v26  ;;  %v204_v52 = vpop.xlane.xlu1 %203 }
 0x148   :  { %689 = vlog2.f32 %v1088_v36  ;;  %v49_v36 = vld [vmem:[%s1245_s2 + $0x10] sm:$0xff] }
 0x149   :  { %691 = vpow2.f32 %v442_v19  ;;  %v500_v57 = vsub.f32 0.0, %v49_v36 }
 0x14a   :  { %v682_v27 = vpop.eup %681 }
 0x14b   :  { %v339_v14 = vpop.xlane.xlu0 %338  ;;  %v684_v32 = vpop.eup %683  ;;  %v401_v35 = vmul.f32 0.6931472, %v682_v27 }
 0x14c   :  { %v375_v18 = vsub.f32 %v339_v14, %v946_v56  ;;  %v47_v56 = vld [vmem:[%s1245_s2] sm:$0xff]  ;;  %v468_v0 = vsub.f32 1.0, %v684_v32  ;;  %v686_v41 = vpop.eup %685 }
 0x14d   :  { %v688_v46 = vpop.eup %687  ;;  %v498_v6 = vsub.f32 0.0, %v47_v56  ;;  %v1138_v53 = vsub.f32 %v377_v45, %v401_v35  ;;  %v469_v62 = vsub.f32 1.0, %v686_v41 }
 0x14e   :  { %v1118_v23 = vsub.f32 %v375_v18, %v397_v29  ;;  %v690_v39 = vpop.eup %689  ;;  %v484_v60 = vmul.f32 %v468_v0, %v468_v0  ;;  %v405_v15 = vmul.f32 0.6931472, %v688_v46  ;;  %v51_v18 = vld [vmem:[%s1245_s2 + $0x20] sm:$0xff] }
 0x14f   :  { %v1120_v28 = vpop.xlane.xlu2 %353  ;;  %v692_v50 = vpop.eup %691  ;;  %v514_v4 = vmul.f32 %v498_v6, %v482_v47  ;;  %v448_v58 = vmul.f32 1.442695, %v1138_v53  ;;  %v403_v14 = vmul.f32 0.6931472, %v690_v39  ;;  %v485_v49 = vmul.f32 %v469_v62, %v469_v62  ;;  %v53_v47 = vld [vmem:[%s1245_s2 + $0x30] sm:$0xff]  ;;  %v54_v62 = vld [vmem:[%s1245_s2 + $0x38] sm:$0xff] }
 0x150   :  { %v444_v21 = vmul.f32 1.442695, %v1118_v23  ;;  %v516_v29 = vmul.f32 %v500_v57, %v484_v60  ;;  %v1149_v22 = vsub.f32 %v379_v30, %v405_v15  ;;  %v470_v13 = vsub.f32 1.0, %v692_v50  ;;  %v360_v27 = vpop.xlane.xlu1 %359 }
 0x151   :  { %v380_v16 = vsub.f32 %v1120_v28, %v978_v37  ;;  %v502_v40 = vsub.f32 0.0, %v51_v18  ;;  %v517_v0 = vmul.f32 %v501_v12, %v485_v49 }
 0x152   :  { %693 = vpow2.f32 %v444_v21  ;;  %v52_v21 = vld [vmem:[%s1245_s2 + $0x28] sm:$0xff]  ;;  %v486_v42 = vmul.f32 %v470_v13, %v470_v13 }
 0x153   :  { %v192_v26 = vpop.xlane.xlu0 %191  ;;  %v503_v37 = vsub.f32 0.0, %v52_v21  ;;  %v533_v57 = vmul.f32 %v517_v0, %v1106_v3 }
 0x154   :  { %695 = vlog2.f32 %v192_v26  ;;  %v518_v61 = vmul.f32 %v502_v40, %v486_v42 }
 0x155   :  { %697 = vpow2.f32 %v446_v44  ;;  %v552_v12 = vsel %vm546_vm0, %v533_v57, 0.0 }
 0x156   :  { %699 = vlog2.f32 %v198_v5  ;;  %v530_v5 = vmul.f32 %v514_v4, %v1099_v55  ;;  %v532_v55 = vmul.f32 %v516_v29, %v1102_v51 }
 0x157   :  { %v207_v2 = vpop.xlane.xlu2 %206  ;;  %701 = vlog2.f32 %v204_v52  ;;  %v452_v52 = vmul.f32 1.442695, %v1149_v22 }
 0x158   :  { %v694_v31 = vpop.eup %693  ;;  %703 = vpow2.f32 %v448_v58  ;;  %v547_v44 = vsel %vm546_vm0, %v530_v5, 0.0  ;;  %v550_v39 = vsel %vm546_vm0, %v532_v55, 0.0  ;;  %v369_v58 = vpop.xlane.xlu1 %368 }
 0x159   :  { %v471_v19 = vsub.f32 1.0, %v694_v31  ;;  %705 = vlog2.f32 %v207_v2 }
 0x15a   :  { %v696_v7 = vpop.eup %695 }
 0x15b   :  { %v348_v17 = vpop.xlane.xlu0 %347  ;;  %v407_v24 = vmul.f32 0.6931472, %v696_v7  ;;  %v698_v32 = vpop.eup %697  ;;  %v487_v28 = vmul.f32 %v471_v19, %v471_v19 }
 0x15c   :  { %v378_v11 = vsub.f32 %v348_v17, %v959_v9  ;;  %v700_v35 = vpop.eup %699  ;;  %v531_v9 = vmul.f32 %v515_v10, %v1093_v20  ;;  %v472_v36 = vsub.f32 1.0, %v698_v32  ;;  %v382_v20 = vsub.f32 %v360_v27, %v975_v34  ;;  %v55_v17 = vld [vmem:[%s1245_s2 + $0x40] sm:$0xff] }
 0x15d   :  { %v1163_v26 = vsub.f32 %v380_v16, %v407_v24  ;;  %v411_v45 = vmul.f32 0.6931472, %v700_v35  ;;  %v702_v51 = vpop.eup %701  ;;  %v519_v15 = vmul.f32 %v503_v37, %v487_v28  ;;  %v385_v32 = vsub.f32 %v369_v58, %v1005_v8  ;;  %v56_v8 = vld [vmem:[%s1245_s2 + $0x48] sm:$0xff] }
 0x15e   :  { %v1158_v56 = vsub.f32 %v378_v11, %v403_v14  ;;  %v548_v6 = vsel %vm546_vm0, %v531_v9, 0.0  ;;  %v704_v59 = vpop.eup %703  ;;  %v488_v2 = vmul.f32 %v472_v36, %v472_v36  ;;  %v415_v3 = vmul.f32 0.6931472, %v702_v51 }
 0x15f   :  { %v366_v46 = vpop.xlane.xlu2 %365  ;;  %v549_v60 = vadd.f32 %v548_v6, %v547_v44  ;;  %v454_v34 = vmul.f32 1.442695, %v1163_v26  ;;  %v706_v50 = vpop.eup %705  ;;  %v1180_v4 = vsub.f32 %v382_v20, %v411_v45  ;;  %v473_v7 = vsub.f32 1.0, %v704_v59 }
 0x160   :  { %v450_v41 = vmul.f32 1.442695, %v1158_v56  ;;  %v384_v30 = vsub.f32 %v366_v46, %v990_v48  ;;  %v505_v14 = vsub.f32 0.0, %v54_v62  ;;  %v417_v29 = vmul.f32 0.6931472, %v706_v50 }
 0x161   :  { %v551_v31 = vadd.f32 %v550_v39, %v549_v60  ;;  %v534_v48 = vmul.f32 %v518_v61, %v1113_v1  ;;  %v535_v18 = vmul.f32 %v519_v15, %v1118_v23  ;;  %v458_v27 = vmul.f32 1.442695, %v1180_v4 }
 0x162   :  { %707 = vpow2.f32 %v450_v41  ;;  %v1188_v11 = vsub.f32 %v384_v30, %v415_v3  ;;  %v489_v21 = vmul.f32 %v473_v7, %v473_v7  ;;  %v506_v16 = vsub.f32 0.0, %v55_v17 }
 0x163   :  { %709 = vlog2.f32 %v1095_v25  ;;  %v201_v54 = vpop.xlane.xlu0 %200  ;;  %v504_v25 = vsub.f32 0.0, %v53_v47  ;;  %v553_v19 = vadd.f32 %v552_v12, %v551_v31  ;;  %v1192_v55 = vsub.f32 %v385_v32, %v417_v29 }
 0x164   :  { %711 = vpow2.f32 %v452_v52  ;;  %v554_v23 = vsel %vm546_vm0, %v534_v48, 0.0  ;;  %v556_v52 = vsel %vm546_vm0, %v535_v18, 0.0  ;;  %v462_v41 = vmul.f32 1.442695, %v1188_v11 }
 0x165   :  { %713 = vpow2.f32 %v454_v34  ;;  %v520_v5 = vmul.f32 %v504_v25, %v488_v2  ;;  %v555_v44 = vadd.f32 %v554_v23, %v553_v19  ;;  %v521_v36 = vmul.f32 %v505_v14, %v489_v21  ;;  %v58_v2 = vld [vmem:[%s1245_s2 + $0x58] sm:$0xff] }
 0x166   :  { %715 = vlog2.f32 %v201_v54  ;;  %v464_v20 = vmul.f32 1.442695, %v1192_v55  ;;  %v507_v6 = vsub.f32 0.0, %v56_v8  ;;  %v57_v54 = vld [vmem:[%s1245_s2 + $0x50] sm:$0xff]  ;;  %v509_v17 = vsub.f32 0.0, %v58_v2 }
 0x167   :  { %717 = vpow2.f32 %v458_v27  ;;  %v536_v28 = vmul.f32 %v520_v5, %v1122_v63  ;;  %v537_v63 = vmul.f32 %v521_v36, %v1138_v53  ;;  %v508_v30 = vsub.f32 0.0, %v57_v54  ;;  %v61_v27 = vld [vmem:[%s1245_s2 + $0x70] sm:$0xff] }
 0x168   :  { %v708_v10 = vpop.eup %707  ;;  %719 = vpow2.f32 %v462_v41  ;;  %v512_v23 = vsub.f32 0.0, %v61_v27 }
 0x169   :  { %v710_v49 = vpop.eup %709  ;;  %v474_v24 = vsub.f32 1.0, %v708_v10  ;;  %v558_v59 = vsel %vm546_vm0, %v536_v28, 0.0  ;;  %v560_v53 = vsel %vm546_vm0, %v537_v63, 0.0  ;;  %v59_v10 = vld [vmem:[%s1245_s2 + $0x60] sm:$0xff] }
 0x16a   :  { %v712_v13 = vpop.eup %711  ;;  %v409_v40 = vmul.f32 0.6931472, %v710_v49 }
 0x16b   :  { %v490_v35 = vmul.f32 %v474_v24, %v474_v24  ;;  %v357_v9 = vpop.xlane.xlu0 %356  ;;  %v475_v0 = vsub.f32 1.0, %v712_v13  ;;  %v714_v42 = vpop.eup %713  ;;  %v510_v24 = vsub.f32 0.0, %v59_v10 }
 0x16c   :  { %v381_v1 = vsub.f32 %v357_v9, %v973_v33  ;;  %v557_v33 = vadd.f32 %v556_v52, %v555_v44  ;;  %v716_v51 = vpop.eup %715  ;;  %v476_v39 = vsub.f32 1.0, %v714_v42  ;;  %v62_v9 = vld [vmem:[%s1245_s2 + $0x78] sm:$0xff] }
 0x16d   :  { %v522_v45 = vmul.f32 %v506_v16, %v490_v35  ;;  %v491_v47 = vmul.f32 %v475_v0, %v475_v0  ;;  %v718_v34 = vpop.eup %717  ;;  %v413_v61 = vmul.f32 0.6931472, %v716_v51  ;;  %v60_v35 = vld [vmem:[%s1245_s2 + $0x68] sm:$0xff]  ;;  %v513_v8 = vsub.f32 0.0, %v62_v9  ;;  %s755_s2 = smov [#allocation2]  }
 0x16e   :  { %v429_v37 = vsub.f32 %v381_v1, %v409_v40  ;;  %v559_v50 = vadd.f32 %v558_v59, %v557_v33  ;;  %v492_v25 = vmul.f32 %v476_v39, %v476_v39  ;;  %v720_v7 = vpop.eup %719  ;;  %v478_v3 = vsub.f32 1.0, %v718_v34  ;;  %s596_s0 = sshll.u32 %s755_s2, 4  ;;  %s597_s0 = int_to_ptr.vmem [resolvable:$true] %s596_s0 }
 0x16f   :  { %v538_v57 = vmul.f32 %v522_v45, %v1158_v56  ;;  %v523_v15 = vmul.f32 %v507_v6, %v491_v47  ;;  %v480_v5 = vsub.f32 1.0, %v720_v7  ;;  %v511_v42 = vsub.f32 0.0, %v60_v35 }
 0x170   :  { %v456_v46 = vmul.f32 1.442695, %v429_v37  ;;  %v524_v29 = vmul.f32 %v508_v30, %v492_v25  ;;  %v494_v13 = vmul.f32 %v478_v3, %v478_v3 }
 0x171   :  { %v562_v56 = vsel %vm546_vm0, %v538_v57, 0.0  ;;  %v539_v14 = vmul.f32 %v523_v15, %v1149_v22  ;;  %v496_v0 = vmul.f32 %v480_v5, %v480_v5 }
 0x172   :  { %721 = vpow2.f32 %v456_v46  ;;  %v540_v21 = vmul.f32 %v524_v29, %v1163_v26  ;;  %v526_v1 = vmul.f32 %v510_v24, %v494_v13 }
 0x173   :  { %v363_v60 = vpop.xlane.xlu0 %362  ;;  %723 = vpow2.f32 %v464_v20  ;;  %v564_v32 = vsel %vm546_vm0, %v539_v14, 0.0  ;;  %v528_v20 = vmul.f32 %v512_v23, %v496_v0 }
 0x174   :  { %v383_v62 = vsub.f32 %v363_v60, %v980_v38  ;;  %v561_v38 = vadd.f32 %v560_v53, %v559_v50  ;;  %v566_v26 = vsel %vm546_vm0, %v540_v21, 0.0  ;;  %v542_v33 = vmul.f32 %v526_v1, %v1180_v4 }
 0x176   :  { %v431_v31 = vsub.f32 %v383_v62, %v413_v61  ;;  %v563_v18 = vadd.f32 %v562_v56, %v561_v38  ;;  %v570_v39 = vsel %vm546_vm0, %v542_v33, 0.0 }
 0x178   :  { %v722_v58 = vpop.eup %721  ;;  %v460_v12 = vmul.f32 1.442695, %v431_v31  ;;  %v565_v40 = vadd.f32 %v564_v32, %v563_v18 }
 0x179   :  { %v477_v49 = vsub.f32 1.0, %v722_v58  ;;  %v724_v48 = vpop.eup %723 }
 0x17a   :  { %725 = vpow2.f32 %v460_v12  ;;  %v481_v16 = vsub.f32 1.0, %v724_v48  ;;  %v567_v45 = vadd.f32 %v566_v26, %v565_v40 }
 0x17b   :  { %v493_v19 = vmul.f32 %v477_v49, %v477_v49 }
 0x17c   :  { %v497_v44 = vmul.f32 %v481_v16, %v481_v16 }
 0x17d   :  { %v525_v22 = vmul.f32 %v509_v17, %v493_v19 }
 0x17e   :  { %v529_v47 = vmul.f32 %v513_v8, %v497_v44 }
 0x17f   :  { %v541_v52 = vmul.f32 %v525_v22, %v429_v37  ;;  %v544_v37 = vmul.f32 %v528_v20, %v1188_v11 }
 0x180   :  { %v726_v41 = vpop.eup %725  ;;  %v545_v63 = vmul.f32 %v529_v47, %v1192_v55 }
 0x181   :  { %v568_v28 = vsel %vm546_vm0, %v541_v52, 0.0  ;;  %v479_v36 = vsub.f32 1.0, %v726_v41  ;;  %v574_v34 = vsel %vm546_vm0, %v544_v37, 0.0 }
 0x182   :  { %v569_v51 = vadd.f32 %v568_v28, %v567_v45  ;;  %v576_v4 = vsel %vm546_vm0, %v545_v63, 0.0 }
 0x183   :  { %v495_v46 = vmul.f32 %v479_v36, %v479_v36 }
 0x184   :  { %v571_v59 = vadd.f32 %v570_v39, %v569_v51 }
 0x185   :  { %v527_v6 = vmul.f32 %v511_v42, %v495_v46 }
 0x187   :  { %v543_v54 = vmul.f32 %v527_v6, %v431_v31 }
 0x189   :  { %v572_v57 = vsel %vm546_vm0, %v543_v54, 0.0 }
 0x18a   :  { %v573_v60 = vadd.f32 %v572_v57, %v571_v59 }
 0x18c   :  { %v575_v50 = vadd.f32 %v574_v34, %v573_v60 }
 0x18e   :  { %v577_v61 = vadd.f32 %v576_v4, %v575_v50 }
 0x190   :  { %578 = vadd.xlane.f32.xlu0 %v577_v61 }
 0x203   :  { %v579_v62 = vpop.xlane.xlu0 %578 }
 0x204   :  { %v580_v15 = vrot.slane %v579_v62, 4 }
 0x206   :  { %v581_v30 = vadd.f32 %v580_v15, %v579_v62 }
 0x208   :  { %v582_v25 = vrot.slane %v581_v30, 2 }
 0x20a   :  { %v583_v2 = vadd.f32 %v582_v25, %v581_v30 }
 0x20c   :  { %v584_v11 = vrot.slane %v583_v2, 1 }
 0x20e   :  { %v585_v31 = vadd.f32 %v584_v11, %v583_v2 }
 0x210   :  { %623 = vpush %v585_v31 }
 0x241   :  { %s624_s26 = spop %623 }
 0x242   :  { %v588_v55 = vstv %s624_s26 }
 0x243   :  { %v589_v7 = vsel %vm587_vm2, %v588_v55, 0.0 }
 0x244   :  { %590 = vst [vmem:[#allocation2] sm:$0x1] %v589_v7 }
 0x245   :  { %601 = dma.vmem_to_hbm [thread:$0]  %s597_s0, 16, %s599_s25, [#allocation3]  }
 0x246   :  { %751 = dma.done.wait [#allocation3], 16  }
 0x247   :  { %752 = vsyncadd [#allocation3], 4294967280 }
 0x248   :  { %606 = vsyncpa [#allocation3], 1 }

</bundles_post_ra>
